<compile_context>
chip_gen: v7x
topology: tpu7x:2x2x1
jax: 0.10.0
libtpu: 0.0.40
codegen_flags: <defaults>
</compile_context>

<pallas_src>
import functools

import jax
import jax.numpy as jnp
from jax.experimental import pallas as pl
from jax.experimental.pallas import tpu as pltpu


def _flash_attn_kernel(q_ref, k_ref, v_ref, wp_ref, bp_ref, o_ref,
                       m_sc, l_sc, acc_sc):
    """grid = (B, q_tiles, kv_tiles); kv axis innermost / 'arbitrary'."""
    ki = pl.program_id(2)

    @pl.when(ki == 0)
    def _init():
        m_sc[...] = jnp.full(m_sc.shape, -jnp.inf, dtype=m_sc.dtype)
        l_sc[...] = jnp.zeros(l_sc.shape, dtype=l_sc.dtype)
        acc_sc[...] = jnp.zeros(acc_sc.shape, dtype=acc_sc.dtype)

    q = q_ref[0]                                    # (H, tq, D) bf16, pre-scaled
    k = k_ref[0]                                    # (H, tk, D) bf16
    v = v_ref[0]                                    # (H, tk, D) bf16

    # Scores for all heads at once: (H, tq, tk), f32 accumulation on the MXU.
    s = jnp.einsum('hqd,hkd->hqk', q, k, preferred_element_type=jnp.float32)

    # Online (flash) softmax update, f32 math (v5e EUP has no bf16 path).
    m_prev = m_sc[...]
    m_new = jnp.maximum(m_prev, jnp.max(s, axis=-1, keepdims=True))
    alpha = jnp.exp(m_prev - m_new)
    p = jnp.exp(s - m_new)
    l_sc[...] = alpha * l_sc[...] + jnp.sum(p, axis=-1, keepdims=True)
    acc_sc[...] = alpha * acc_sc[...] + jnp.einsum(
        'hqk,hkd->hqd', p.astype(jnp.bfloat16), v,
        preferred_element_type=jnp.float32)
    m_sc[...] = m_new

    @pl.when(ki == pl.num_programs(2) - 1)
    def _finalize():
        # Exact normalization (once per q-tile), merge heads, output projection
        # (+ bias), single lane-dense (tq, C) store.
        y = acc_sc[...] / l_sc[...]                           # (H, tq, D) f32
        h, tq, d = y.shape
        y2 = jnp.transpose(y, (1, 0, 2)).reshape(tq, h * d)   # (tq, C)
        out = jnp.dot(y2.astype(jnp.bfloat16), wp_ref[...],
                      preferred_element_type=jnp.float32)
        out = out + bp_ref[...]                               # (1, C) broadcast
        o_ref[0] = out.astype(o_ref.dtype)


def _tpu_defaults():
    """(preferred_tile, vmem_limit_bytes) per TPU generation."""
    try:
        kind = jax.devices()[0].device_kind.lower()
    except Exception:  # pragma: no cover - defensive; default is always valid
        kind = ""
    if "v7" in kind:
        # 64 MiB physical VMEM: small tiles + moderate scoped limit.
        return 128, 48 * 1024 * 1024
    if "v6" in kind:
        # 2x256x256 MXU, 128 MiB VMEM: keep 256 tiles with extra headroom.
        return 256, 64 * 1024 * 1024
    # v5e (4x128 MXU, single vst slot) and anything unrecognized.
    return 128, 32 * 1024 * 1024


def _pick_block(n, preferred):
    for t in (preferred, 128):
        if n % t == 0:
            return t
    return n


def attention_forward(x, w_qkv_t, w_proj_t, b_proj, *, num_heads,
                      block_q=None, block_k=None):
    """x: (B, N, C) f32; w_qkv_t: (C, 3C); w_proj_t: (C, C); b_proj: (1, C)."""
    B, N, C = x.shape
    assert C % num_heads == 0
    H = num_heads
    D = C // H
    scale = D ** (-0.5)

    preferred, vmem_limit = _tpu_defaults()
    tq = block_q or _pick_block(N, preferred)
    tk = block_k or _pick_block(N, preferred)
    assert N % tq == 0 and N % tk == 0

    bf16 = jnp.bfloat16

    # --- Hoisted QKV projection (perf review item #1) ------------------------
    # One einsum (bf16 MXU inputs, f32 accumulation) plus a single head-major
    # relayout, done once per token instead of once per q-tile x kv-step.
    qkv = jnp.einsum('bnc,ck->bnk', x.astype(bf16), w_qkv_t.astype(bf16),
                     preferred_element_type=jnp.float32)         # (B, N, 3C)
    qkv = qkv.reshape(B, N, 3, H, D)
    qkv = jnp.transpose(qkv, (2, 0, 3, 1, 4))                    # (3, B, H, N, D)
    q = (qkv[0] * scale).astype(bf16)   # fold softmax scale in f32, then cast
    k = qkv[1].astype(bf16)
    v = qkv[2].astype(bf16)

    w_p = w_proj_t.astype(bf16)
    b_p = b_proj.reshape(1, C).astype(jnp.float32)

    kernel = functools.partial(_flash_attn_kernel)

    grid = (B, N // tq, N // tk)
    return pl.pallas_call(
        kernel,
        out_shape=jax.ShapeDtypeStruct((B, N, C), x.dtype),
        grid_spec=pltpu.PrefetchScalarGridSpec(
            num_scalar_prefetch=0,
            grid=grid,
            in_specs=[
                # Q tile: index map constant over kv axis -> fetched once per
                # (b, q-tile), reused for every kv step.
                pl.BlockSpec((1, H, tq, D), lambda b, qi, ki: (b, 0, qi, 0)),
                # K / V tiles, head-major, pre-projected.
                pl.BlockSpec((1, H, tk, D), lambda b, qi, ki: (b, 0, ki, 0)),
                pl.BlockSpec((1, H, tk, D), lambda b, qi, ki: (b, 0, ki, 0)),
                # Resident output-projection weight / bias (constant index map
                # -> no refetch across the whole grid).
                pl.BlockSpec((C, C), lambda b, qi, ki: (0, 0)),
                pl.BlockSpec((1, C), lambda b, qi, ki: (0, 0)),
            ],
            out_specs=pl.BlockSpec((1, tq, C), lambda b, qi, ki: (b, qi, 0)),
            scratch_shapes=[
                pltpu.VMEM((H, tq, 1), jnp.float32),    # running max m
                pltpu.VMEM((H, tq, 1), jnp.float32),    # running sum l
                pltpu.VMEM((H, tq, D), jnp.float32),    # output accumulator
            ],
        ),
        compiler_params=pltpu.CompilerParams(
            # B * (N // tq) parallel iterations shard across TCs on v7x.
            dimension_semantics=("parallel", "parallel", "arbitrary"),
            vmem_limit_bytes=vmem_limit,
        ),
    )(q, k, v, w_p, b_p)


def attention_reference(x, w_qkv_t, w_proj_t, b_proj, *, num_heads):
    """Pure-JAX f32 reference mirroring the PyTorch forward (non-fused branch)."""
    B, N, C = x.shape
    D = C // num_heads
    scale = D ** (-0.5)
    qkv = x @ w_qkv_t                                            # (B, N, 3C)
    qkv = qkv.reshape(B, N, 3, num_heads, D)
    qkv = jnp.transpose(qkv, (2, 0, 3, 1, 4))                    # (3, B, H, N, D)
    q, k, v = qkv[0], qkv[1], qkv[2]
    q = q * scale
    attn = jnp.einsum('bhnd,bhmd->bhnm', q, k)
    attn = jax.nn.softmax(attn, axis=-1)
    y = jnp.einsum('bhnm,bhmd->bhnd', attn, v)
    y = jnp.transpose(y, (0, 2, 1, 3)).reshape(B, N, C)
    return y @ w_proj_t + b_proj.reshape(1, 1, C)


if __name__ == "__main__":
    # Small shapes consistent with the module: B=2, N=8 tokens, dim=32, 8 heads.
    # (Real SiT configs — C=1152, N>=256 — exercise the lane-dense paths.)
    B, N, C = 2, 8, 32
    num_heads = 8

    key = jax.random.PRNGKey(0)
    kx, kq, kp, kb = jax.random.split(key, 4)
    x = jax.random.normal(kx, (B, N, C), dtype=jnp.float32)

    # nn.Linear(dim, 3*dim, bias=False): weight (3C, C); we store its transpose.
    w_qkv_t = (jax.random.normal(kq, (C, 3 * C), dtype=jnp.float32)
               * (1.0 / jnp.sqrt(C)))
    # nn.Linear(dim, dim) with bias: weight (C, C) + bias (C,).
    w_proj_t = (jax.random.normal(kp, (C, C), dtype=jnp.float32)
                * (1.0 / jnp.sqrt(C)))
    b_proj = jax.random.normal(kb, (1, C), dtype=jnp.float32) * 0.1

    out = attention_forward(x, w_qkv_t, w_proj_t, b_proj, num_heads=num_heads)
    out = jax.block_until_ready(out)

    ref = attention_reference(x, w_qkv_t, w_proj_t, b_proj, num_heads=num_heads)
    assert out.shape == (B, N, C)
    # bf16 MXU inputs (f32 accumulation, exact softmax normalization) vs the
    # f32 reference; tolerance kept conservative for the bf16 casts.
    assert jnp.allclose(out, ref, atol=5e-2, rtol=5e-2), "mismatch vs reference"

    print("KERNEL_OK")
</pallas_src>

<mosaic_0001>
module attributes {stable_mosaic.version = 11 : i64} {
  func.func @_flash_attn_kernel(%arg0: i32, %arg1: i32, %arg2: i32, %arg3: memref<1x8x8x4xbf16, #tpu.memory_space<vmem>>, %arg4: memref<1x8x8x4xbf16, #tpu.memory_space<vmem>>, %arg5: memref<1x8x8x4xbf16, #tpu.memory_space<vmem>>, %arg6: memref<32x32xbf16, #tpu.memory_space<vmem>>, %arg7: memref<1x32xf32, #tpu.memory_space<vmem>>, %arg8: memref<1x8x32xf32, #tpu.memory_space<vmem>>, %arg9: memref<8x8x1xf32, #tpu.memory_space<vmem>>, %arg10: memref<8x8x1xf32, #tpu.memory_space<vmem>>, %arg11: memref<8x8x4xf32, #tpu.memory_space<vmem>>) attributes {dimension_semantics = [#tpu.dimension_semantics<parallel>, #tpu.dimension_semantics<parallel>, #tpu.dimension_semantics<arbitrary>], iteration_bounds = array<i64: 2, 1, 1>, scalar_prefetch = 0 : i64, scratch_operands = 3 : i64, tpu.core_type = #tpu.core_type<tc>, window_params = [{transform_indices = @transform_0, window_bounds = array<i64: 1, 8, 8, 4>}, {transform_indices = @transform_1, window_bounds = array<i64: 1, 8, 8, 4>}, {transform_indices = @transform_2, window_bounds = array<i64: 1, 8, 8, 4>}, {pipeline_mode = #tpu.pipeline_mode<synchronous>, transform_indices = @transform_3, window_bounds = array<i64: 32, 32>}, {pipeline_mode = #tpu.pipeline_mode<synchronous>, transform_indices = @transform_4, window_bounds = array<i64: 1, 32>}, {transform_indices = @transform_5, window_bounds = array<i64: 1, 8, 32>}]} {
    %c0_i32 = arith.constant 0 : i32
    %0 = arith.cmpi eq, %arg2, %c0_i32 : i32
    %1 = arith.extui %0 : i1 to i32
    %c0_i32_0 = arith.constant 0 : i32
    %2 = arith.cmpi ne, %1, %c0_i32_0 : i32
    scf.if %2 {
      %cst_35 = arith.constant 0xFF800000 : f32
      %36 = vector.broadcast %cst_35 : f32 to vector<8x8x1xf32>
      %c0_36 = arith.constant 0 : index
      %c0_37 = arith.constant 0 : index
      %c0_38 = arith.constant 0 : index
      %37 = vector.load %arg9[%c0_36, %c0_37, %c0_38] : memref<8x8x1xf32, #tpu.memory_space<vmem>>, vector<8x8x1xf32>
      tpu.vector_store %arg9[%c0_36, %c0_37, %c0_38], %36 {strides = array<i32>} : memref<8x8x1xf32, #tpu.memory_space<vmem>>, vector<8x8x1xf32>,
      %cst_39 = arith.constant 0.000000e+00 : f32
      %38 = vector.broadcast %cst_39 : f32 to vector<8x8x1xf32>
      %c0_40 = arith.constant 0 : index
      %c0_41 = arith.constant 0 : index
      %c0_42 = arith.constant 0 : index
      %39 = vector.load %arg10[%c0_40, %c0_41, %c0_42] : memref<8x8x1xf32, #tpu.memory_space<vmem>>, vector<8x8x1xf32>
      tpu.vector_store %arg10[%c0_40, %c0_41, %c0_42], %38 {strides = array<i32>} : memref<8x8x1xf32, #tpu.memory_space<vmem>>, vector<8x8x1xf32>,
      %cst_43 = arith.constant 0.000000e+00 : f32
      %40 = vector.broadcast %cst_43 : f32 to vector<8x8x4xf32>
      %c0_44 = arith.constant 0 : index
      %c0_45 = arith.constant 0 : index
      %c0_46 = arith.constant 0 : index
      %41 = vector.load %arg11[%c0_44, %c0_45, %c0_46] : memref<8x8x4xf32, #tpu.memory_space<vmem>>, vector<8x8x4xf32>
      tpu.vector_store %arg11[%c0_44, %c0_45, %c0_46], %40 {strides = array<i32>} : memref<8x8x4xf32, #tpu.memory_space<vmem>>, vector<8x8x4xf32>,
    } else {
    }
    %c0 = arith.constant 0 : index
    %c0_1 = arith.constant 0 : index
    %c0_2 = arith.constant 0 : index
    %c0_3 = arith.constant 0 : index
    %3 = vector.load %arg3[%c0, %c0_1, %c0_2, %c0_3] : memref<1x8x8x4xbf16, #tpu.memory_space<vmem>>, vector<1x8x8x4xbf16>
    %4 = vector.shape_cast %3 : vector<1x8x8x4xbf16> to vector<8x8x4xbf16>
    %c0_4 = arith.constant 0 : index
    %c0_5 = arith.constant 0 : index
    %c0_6 = arith.constant 0 : index
    %c0_7 = arith.constant 0 : index
    %5 = vector.load %arg4[%c0_4, %c0_5, %c0_6, %c0_7] : memref<1x8x8x4xbf16, #tpu.memory_space<vmem>>, vector<1x8x8x4xbf16>
    %6 = vector.shape_cast %5 : vector<1x8x8x4xbf16> to vector<8x8x4xbf16>
    %c0_8 = arith.constant 0 : index
    %c0_9 = arith.constant 0 : index
    %c0_10 = arith.constant 0 : index
    %c0_11 = arith.constant 0 : index
    %7 = vector.load %arg5[%c0_8, %c0_9, %c0_10, %c0_11] : memref<1x8x8x4xbf16, #tpu.memory_space<vmem>>, vector<1x8x8x4xbf16>
    %8 = vector.shape_cast %7 : vector<1x8x8x4xbf16> to vector<8x8x4xbf16>
    "tpu.trace_start"() <{level = 10 : i32, message = "hqd,hkd->hqk"}> : () -> ()
    %cst = arith.constant dense<0.000000e+00> : vector<8x8x8xf32>
    %9 = tpu.matmul %4, %6, %cst {dimension_numbers = #tpu.dot_dimension_numbers<[2], [2], [1], [1], [0, 0, 0, 1, 1, 1], [0], [0]>} : vector<8x8x4xbf16>, vector<8x8x4xbf16>, vector<8x8x8xf32> -> vector<8x8x8xf32>
    "tpu.trace_stop"() : () -> ()
    %c0_12 = arith.constant 0 : index
    %c0_13 = arith.constant 0 : index
    %c0_14 = arith.constant 0 : index
    %10 = vector.load %arg9[%c0_12, %c0_13, %c0_14] : memref<8x8x1xf32, #tpu.memory_space<vmem>>, vector<8x8x1xf32>
    %cst_15 = arith.constant dense<0xFF800000> : vector<8x8xf32>
    %11 = vector.multi_reduction <maximumf>, %9, %cst_15 [2] : vector<8x8x8xf32> to vector<8x8xf32>
    %12 = vector.shape_cast %11 : vector<8x8xf32> to vector<8x8x1xf32>
    %13 = arith.maximumf %10, %12 : vector<8x8x1xf32>
    %14 = arith.subf %10, %13 : vector<8x8x1xf32>
    %15 = math.exp %14 : vector<8x8x1xf32>
    %16 = vector.broadcast %13 : vector<8x8x1xf32> to vector<8x8x8xf32>
    %17 = arith.subf %9, %16 : vector<8x8x8xf32>
    %18 = math.exp %17 : vector<8x8x8xf32>
    %c0_16 = arith.constant 0 : index
    %c0_17 = arith.constant 0 : index
    %c0_18 = arith.constant 0 : index
    %19 = vector.load %arg10[%c0_16, %c0_17, %c0_18] : memref<8x8x1xf32, #tpu.memory_space<vmem>>, vector<8x8x1xf32>
    %20 = arith.mulf %15, %19 : vector<8x8x1xf32>
    %cst_19 = arith.constant dense<0.000000e+00> : vector<8x8xf32>
    %21 = vector.multi_reduction <add>, %18, %cst_19 [2] : vector<8x8x8xf32> to vector<8x8xf32>
    %22 = vector.shape_cast %21 : vector<8x8xf32> to vector<8x8x1xf32>
    %23 = arith.addf %20, %22 : vector<8x8x1xf32>
    %c0_20 = arith.constant 0 : index
    %c0_21 = arith.constant 0 : index
    %c0_22 = arith.constant 0 : index
    %24 = vector.load %arg10[%c0_20, %c0_21, %c0_22] : memref<8x8x1xf32, #tpu.memory_space<vmem>>, vector<8x8x1xf32>
    tpu.vector_store %arg10[%c0_20, %c0_21, %c0_22], %23 {strides = array<i32>} : memref<8x8x1xf32, #tpu.memory_space<vmem>>, vector<8x8x1xf32>,
    %c0_23 = arith.constant 0 : index
    %c0_24 = arith.constant 0 : index
    %c0_25 = arith.constant 0 : index
    %25 = vector.load %arg11[%c0_23, %c0_24, %c0_25] : memref<8x8x4xf32, #tpu.memory_space<vmem>>, vector<8x8x4xf32>
    %26 = vector.broadcast %15 : vector<8x8x1xf32> to vector<8x8x4xf32>
    %27 = arith.mulf %26, %25 : vector<8x8x4xf32>
    %28 = arith.truncf %18 : vector<8x8x8xf32> to vector<8x8x8xbf16>
    "tpu.trace_start"() <{level = 10 : i32, message = "hqk,hkd->hqd"}> : () -> ()
    %cst_26 = arith.constant dense<0.000000e+00> : vector<8x8x4xf32>
    %29 = tpu.matmul %28, %8, %cst_26 {dimension_numbers = #tpu.dot_dimension_numbers<[2], [1], [1], [2], [0, 0, 0, 1, 1, 2], [0], [0]>} : vector<8x8x8xbf16>, vector<8x8x4xbf16>, vector<8x8x4xf32> -> vector<8x8x4xf32>
    "tpu.trace_stop"() : () -> ()
    %30 = arith.addf %27, %29 : vector<8x8x4xf32>
    %c0_27 = arith.constant 0 : index
    %c0_28 = arith.constant 0 : index
    %c0_29 = arith.constant 0 : index
    %31 = vector.load %arg11[%c0_27, %c0_28, %c0_29] : memref<8x8x4xf32, #tpu.memory_space<vmem>>, vector<8x8x4xf32>
    tpu.vector_store %arg11[%c0_27, %c0_28, %c0_29], %30 {strides = array<i32>} : memref<8x8x4xf32, #tpu.memory_space<vmem>>, vector<8x8x4xf32>,
    %c0_30 = arith.constant 0 : index
    %c0_31 = arith.constant 0 : index
    %c0_32 = arith.constant 0 : index
    %32 = vector.load %arg9[%c0_30, %c0_31, %c0_32] : memref<8x8x1xf32, #tpu.memory_space<vmem>>, vector<8x8x1xf32>
    tpu.vector_store %arg9[%c0_30, %c0_31, %c0_32], %13 {strides = array<i32>} : memref<8x8x1xf32, #tpu.memory_space<vmem>>, vector<8x8x1xf32>,
    %c0_i32_33 = arith.constant 0 : i32
    %33 = arith.cmpi eq, %arg2, %c0_i32_33 : i32
    %34 = arith.extui %33 : i1 to i32
    %c0_i32_34 = arith.constant 0 : i32
    %35 = arith.cmpi ne, %34, %c0_i32_34 : i32
    scf.if %35 {
      %c0_35 = arith.constant 0 : index
      %c0_36 = arith.constant 0 : index
      %c0_37 = arith.constant 0 : index
      %36 = vector.load %arg11[%c0_35, %c0_36, %c0_37] : memref<8x8x4xf32, #tpu.memory_space<vmem>>, vector<8x8x4xf32>
      %c0_38 = arith.constant 0 : index
      %c0_39 = arith.constant 0 : index
      %c0_40 = arith.constant 0 : index
      %37 = vector.load %arg10[%c0_38, %c0_39, %c0_40] : memref<8x8x1xf32, #tpu.memory_space<vmem>>, vector<8x8x1xf32>
      %38 = vector.broadcast %37 : vector<8x8x1xf32> to vector<8x8x4xf32>
      %39 = arith.divf %36, %38 : vector<8x8x4xf32>
      %40 = tpu.transpose %39, [1, 0, 2] : vector<8x8x4xf32> -> vector<8x8x4xf32>
      %41 = vector.shape_cast %40 : vector<8x8x4xf32> to vector<8x32xf32>
      %42 = arith.truncf %41 : vector<8x32xf32> to vector<8x32xbf16>
      %c0_41 = arith.constant 0 : index
      %c0_42 = arith.constant 0 : index
      %43 = vector.load %arg6[%c0_41, %c0_42] : memref<32x32xbf16, #tpu.memory_space<vmem>>, vector<32x32xbf16>
      %cst_43 = arith.constant dense<0.000000e+00> : vector<8x32xf32>
      %44 = tpu.matmul %42, %43, %cst_43 {dimension_numbers = #tpu.dot_dimension_numbers<[1], [0], [0], [1], [0, 0, 1, 1], [], []>} : vector<8x32xbf16>, vector<32x32xbf16>, vector<8x32xf32> -> vector<8x32xf32>
      %c0_44 = arith.constant 0 : index
      %c0_45 = arith.constant 0 : index
      %45 = vector.load %arg7[%c0_44, %c0_45] : memref<1x32xf32, #tpu.memory_space<vmem>>, vector<1x32xf32>
      %46 = vector.broadcast %45 : vector<1x32xf32> to vector<8x32xf32>
      %47 = arith.addf %44, %46 : vector<8x32xf32>
      %c0_46 = arith.constant 0 : index
      %c0_47 = arith.constant 0 : index
      %c0_48 = arith.constant 0 : index
      %48 = vector.load %arg8[%c0_46, %c0_47, %c0_48] : memref<1x8x32xf32, #tpu.memory_space<vmem>>, vector<1x8x32xf32>
      %49 = vector.shape_cast %48 : vector<1x8x32xf32> to vector<8x32xf32>
      %50 = vector.shape_cast %47 : vector<8x32xf32> to vector<1x8x32xf32>
      tpu.vector_store %arg8[%c0_46, %c0_47, %c0_48], %50 {strides = array<i32>} : memref<1x8x32xf32, #tpu.memory_space<vmem>>, vector<1x8x32xf32>,
    } else {
    }
    return
  }
  func.func @transform_0(%arg0: i32, %arg1: i32, %arg2: i32) -> (i32, i32, i32, i32) {
    %c0_i32 = arith.constant 0 : i32
    %c0_i32_0 = arith.constant 0 : i32
    %c0_i32_1 = arith.constant 0 : i32
    return %arg0, %c0_i32, %arg1, %c0_i32_0 : i32, i32, i32, i32
  }
  func.func @transform_1(%arg0: i32, %arg1: i32, %arg2: i32) -> (i32, i32, i32, i32) {
    %c0_i32 = arith.constant 0 : i32
    %c0_i32_0 = arith.constant 0 : i32
    %c0_i32_1 = arith.constant 0 : i32
    return %arg0, %c0_i32, %arg2, %c0_i32_0 : i32, i32, i32, i32
  }
  func.func @transform_2(%arg0: i32, %arg1: i32, %arg2: i32) -> (i32, i32, i32, i32) {
    %c0_i32 = arith.constant 0 : i32
    %c0_i32_0 = arith.constant 0 : i32
    %c0_i32_1 = arith.constant 0 : i32
    return %arg0, %c0_i32, %arg2, %c0_i32_0 : i32, i32, i32, i32
  }
  func.func @transform_3(%arg0: i32, %arg1: i32, %arg2: i32) -> (i32, i32) {
    %c0_i32 = arith.constant 0 : i32
    %c0_i32_0 = arith.constant 0 : i32
    %c0_i32_1 = arith.constant 0 : i32
    return %c0_i32, %c0_i32_0 : i32, i32
  }
  func.func @transform_4(%arg0: i32, %arg1: i32, %arg2: i32) -> (i32, i32) {
    %c0_i32 = arith.constant 0 : i32
    %c0_i32_0 = arith.constant 0 : i32
    %c0_i32_1 = arith.constant 0 : i32
    return %c0_i32, %c0_i32_0 : i32, i32
  }
  func.func @transform_5(%arg0: i32, %arg1: i32, %arg2: i32) -> (i32, i32, i32) {
    %c0_i32 = arith.constant 0 : i32
    %c0_i32_0 = arith.constant 0 : i32
    return %arg0, %arg1, %c0_i32 : i32, i32, i32
  }
}

</mosaic_0001>

<bundles_post_ra>
// kernel: tpu_custom_call.1
= control target key start
LH: loop header
LB: loop body
LE: loop exit
PB: predicated region body
PF: predicated region fallthrough
CT: control target
= control target key end

     0   :  { %10 = vsyncpa [#allocation6], 0  ;;  %s2905_s0 = inlined_call_operand.vmem [shape: bf16[2,8,8,4], index: 0, kind: input, shape index: {}]   ;;  %s2906_s1 = inlined_call_operand.vmem [shape: bf16[2,8,8,4], index: 1, kind: input, shape index: {}]   ;;  %s2907_s2 = inlined_call_operand.vmem [shape: bf16[2,8,8,4], index: 2, kind: input, shape index: {}]   ;;  %s2908_s3 = inlined_call_operand.vmem [shape: bf16[32,32], index: 3, kind: input, shape index: {}]   ;;  %s2909_s4 = inlined_call_operand.vmem [shape: f32[1,32], index: 4, kind: input, shape index: {}]   ;;  %s2910_s5 = inlined_call_operand.hbm [shape: f32[2,8,32], index: 5, kind: output, shape index: {}]  }
   0x1   :  { %12 = vsyncpa [#allocation6 + $0x1], 0  ;;  %s2398_s18 = smov 0   ;;  %s2400_s19 = smov 0  }
   0x2   :  { %s2402_s20 = smov 0   ;;  %s2404_s21 = smov 0  }
   0x3   :  { %s2406_s22 = smov 0   ;;  %s2408_s23 = smov 0  }
   0x4 LB: > { %s1968_s24 = sadd.s32 4294967295, %s2352_s23   ;;  %s1969_s25 = sadd.s32 4294967294, %s2352_s23   ;;  %s2352_s23 = sphi %s2408_s23, %s18_s23   ;;  %s2348_s22 = sphi %s2406_s22, %s2917_s22   ;;  %s2344_s21 = sphi %s2404_s21, %s2916_s21   ;;  %s2340_s20 = sphi %s2402_s20, %s2915_s20   ;;  %s2336_s19 = sphi %s2400_s19, %s2914_s19   ;;  %s2332_s18 = sphi %s2398_s18, %s2913_s18  }
   0x5   : > { %s37_s26 = sadd.s32 1, %s2348_s22  ;;  %s172_s27 = sadd.s32 1, %s2340_s20 }
   0x6   : > { %p39_p0 = scmp.ge.s32.totalorder %s37_s26, 2  ;;  %p182_p1 = scmp.ne.s32.totalorder %s2340_s20, %s2336_s19 }
   0x7   : > { %p183_p2 = scmp.eq.s32.totalorder %s1968_s24, 1  ;;  %p188_p3 = scmp.ne.s32.totalorder %s2336_s19, %s2332_s18 }
   0x8   : > { %s2919_s26 = smov (%p39_p0, %s37_s26), 0  ;;  %p189_p5 = scmp.eq.s32.totalorder %s1969_s25, 1 }
   0x9   : > { %p2438_p4 = por %p183_p2, %p182_p1  ;;  %s167_s29 = ssub.s32 %s2348_s22, %s2919_s26 }
   0xa   : > { %p1972_p6 = scmp.ge.s32.totalorder %s2352_s23, 1  ;;  %p170_p7 = scmp.eq.s32.totalorder %s167_s29, 0 }
   0xb   : > { %p2445_p8 = por %p189_p5, %p188_p3  ;;  %p246_p9 = scmp.lt.s32.totalorder %s2352_s23, 3 }
   0xc   : > { %s2451_s6 = scalar_select %p170_p7, %s2340_s20, %s172_s27  }
   0xd   : > { %p247_p10 = pnand %p1972_p6, %p246_p9 }
   0xe   : > { %p293_p11 = scmp.lt.s32.totalorder (!%p247_p10), %s2344_s21, 1  ;;  %vm339_vm0 = vcmask (!%p247_p10), 31744   ;;  %v2354_v0 = vmov (!%p247_p10), 0.0   ;;  %vm2355_vm1 = vmmov (!%p247_p10), 0   ;;  %vm322_vm2 = vcmask (!%p247_p10), 7168   ;;  %s2360_s24 = smov (!%p247_p10), 8  }
   0xf   : > { %250 = sbr.rel (%p247_p10) target bundleno = 1226 (0x4ca), region = 40  ;;  %2050 = vmatprep.subr.bf16.mxu0 (!%p247_p10), %v2354_v0  ;;  %340 = vst.msk [vmem:[#allocation4] sm:$0xff] (!%p247_p10), %vm339_vm0, %v2354_v0  ;;  %341 = vst.msk [vmem:[#allocation4 + $0x8] sm:$0xff] (!%p247_p10), %vm339_vm0, %v2354_v0  ;;  %2056 = vmatprep.subr.bf16.mxu1 (!%p247_p10), %v2354_v0  ;;  %v2356_v25 = vmov (!%p247_p10), -inf   ;;  %vm749_vm3 = vcmask (!%p247_p10), 64512   ;;  %v2357_v52 = vmov (!%p247_p10), 0  }
  0x10   : > { %342 = vst.msk [vmem:[#allocation4 + $0x10] sm:$0xff] (!%p247_p10), %vm339_vm0, %v2354_v0  ;;  %343 = vst.msk [vmem:[#allocation4 + $0x18] sm:$0xff] (!%p247_p10), %vm339_vm0, %v2354_v0  ;;  %2052 = vmatprep.mubr.msk.bf16.mxu0 (!%p247_p10), %vm2355_vm1, %v2354_v0  ;;  %2058 = vmatprep.mubr.msk.bf16.mxu1 (!%p247_p10), %vm2355_vm1, %v2354_v0  ;;  %vm994_vm4 = vcmask (!%p247_p10), 1043456   ;;  %s2361_s25 = smov (!%p247_p10), 4   ;;  %s2363_s10 = smov (!%p247_p10), 20   ;;  %vm1761_vm5 = vcmask (!%p247_p10), 97280  }
  0x11   : > { %344 = vst.msk [vmem:[#allocation4 + $0x20] sm:$0xff] (!%p247_p10), %vm339_vm0, %v2354_v0  ;;  %345 = vst.msk [vmem:[#allocation4 + $0x28] sm:$0xff] (!%p247_p10), %vm339_vm0, %v2354_v0  ;;  %2222 = vset.pattern.permute.xlu0 (!%p247_p10), %v2357_v52  ;;  %2223 = vset.pattern.permute.xlu1 (!%p247_p10), %v2357_v52  ;;  %s2365_s12 = smov (!%p247_p10), 28   ;;  %s2366_s13 = smov (!%p247_p10), 24   ;;  %vm1763_vm6 = vcmask (!%p247_p10), 130048   ;;  %vm1765_vm7 = vcmask (!%p247_p10), 162816  }
  0x12   : > { %346 = vst.msk [vmem:[#allocation4 + $0x30] sm:$0xff] (!%p247_p10), %vm339_vm0, %v2354_v0  ;;  %347 = vst.msk [vmem:[#allocation4 + $0x38] sm:$0xff] (!%p247_p10), %vm339_vm0, %v2354_v0  ;;  %vm1767_vm8 = vcmask (!%p247_p10), 195584   ;;  %vm1769_vm9 = vcmask (!%p247_p10), 228352   ;;  %vm1795_vm10 = vcmask (!%p247_p10), 261120  }
  0x13   : > { %323 = vst.msk [vmem:[#allocation2] sm:$0xff] (!%p247_p10), %vm322_vm2, %v2356_v25  ;;  %324 = vst.msk [vmem:[#allocation2 + $0x8] sm:$0xff] (!%p247_p10), %vm322_vm2, %v2356_v25 }
  0x14   : > { %325 = vst.msk [vmem:[#allocation2 + $0x10] sm:$0xff] (!%p247_p10), %vm322_vm2, %v2356_v25  ;;  %326 = vst.msk [vmem:[#allocation2 + $0x18] sm:$0xff] (!%p247_p10), %vm322_vm2, %v2356_v25 }
  0x15   : > { %327 = vst.msk [vmem:[#allocation2 + $0x20] sm:$0xff] (!%p247_p10), %vm322_vm2, %v2356_v25  ;;  %328 = vst.msk [vmem:[#allocation2 + $0x28] sm:$0xff] (!%p247_p10), %vm322_vm2, %v2356_v25 }
  0x16   : > { %s294_s7 = scalar_select %p293_p11, %s2344_s21, 1  ;;  %329 = vst.msk [vmem:[#allocation2 + $0x30] sm:$0xff] %vm322_vm2, %v2356_v25  ;;  %330 = vst.msk [vmem:[#allocation2 + $0x38] sm:$0xff] %vm322_vm2, %v2356_v25 }
  0x17   : > { %331 = vst.msk [vmem:[#allocation3] sm:$0xff] %vm322_vm2, %v2354_v0  ;;  %332 = vst.msk [vmem:[#allocation3 + $0x8] sm:$0xff] %vm322_vm2, %v2354_v0 }
  0x18   : > { %s2477_s8 = sshll.u32 %s294_s7, 5  ;;  %333 = vst.msk [vmem:[#allocation3 + $0x10] sm:$0xff] %vm322_vm2, %v2354_v0  ;;  %334 = vst.msk [vmem:[#allocation3 + $0x18] sm:$0xff] %vm322_vm2, %v2354_v0  ;;  %s2362_s7 = smov 12  }
  0x19   : > { %s2483_s11 = scalar_lea.vmem %s2906_s1, %s2477_s8  ;;  %s2493_s14 = scalar_lea.vmem %s2905_s0, %s2477_s8  ;;  %335 = vst.msk [vmem:[#allocation3 + $0x20] sm:$0xff] %vm322_vm2, %v2354_v0  ;;  %336 = vst.msk [vmem:[#allocation3 + $0x28] sm:$0xff] %vm322_vm2, %v2354_v0 }
  0x1a   : > { %v356_v1 = vld [vmem:[%s2483_s11] sm:$0xf]  ;;  %v357_v2 = vld [vmem:[%s2483_s11 + $0x4] sm:$0xf]  ;;  %v358_v5 = vld [vmem:[%s2483_s11 + $0x8] sm:$0xf]  ;;  %s2646_s17 = scalar_lea.vmem %s2907_s2, %s2477_s8 }
  0x1b   : > { %v377_v3 = vsel %vm339_vm0, %v356_v1, 0  ;;  %v423_v4 = vsel %vm339_vm0, %v357_v2, 0  ;;  %v359_v6 = vld [vmem:[%s2483_s11 + $0xc] sm:$0xf]  ;;  %v348_v7 = vld [vmem:[%s2493_s14] sm:$0xf] }
  0x1c   : > { %2051 = vmatpush3.bf16.xpose.msra.mxu0 %v377_v3  ;;  %2057 = vmatpush3.bf16.xpose.msra.mxu1 %v423_v4  ;;  %v349_v8 = vld [vmem:[%s2493_s14 + $0x4] sm:$0xf]  ;;  %v469_v9 = vsel %vm339_vm0, %v358_v5, 0  ;;  %v515_v10 = vsel %vm339_vm0, %v359_v6, 0  ;;  %v360_v11 = vld [vmem:[%s2483_s11 + $0x10] sm:$0xf] }
  0x1d   : > { %2062 = vmatprep.subr.bf16.mxu0 %v2354_v0  ;;  %2068 = vmatprep.subr.bf16.mxu1 %v2354_v0  ;;  %v361_v12 = vld [vmem:[%s2483_s11 + $0x14] sm:$0xf]  ;;  %v350_v13 = vld [vmem:[%s2493_s14 + $0x8] sm:$0xf]  ;;  %v351_v14 = vld [vmem:[%s2493_s14 + $0xc] sm:$0xf] }
  0x1e   : > { %v561_v15 = vsel %vm339_vm0, %v360_v11, 0  ;;  %v607_v16 = vsel %vm339_vm0, %v361_v12, 0  ;;  %v362_v17 = vld [vmem:[%s2483_s11 + $0x18] sm:$0xf]  ;;  %v363_v18 = vld [vmem:[%s2483_s11 + $0x1c] sm:$0xf] }
  0x1f   : > { %v352_v19 = vld [vmem:[%s2493_s14 + $0x10] sm:$0xf]  ;;  %v353_v20 = vld [vmem:[%s2493_s14 + $0x14] sm:$0xf]  ;;  %v653_v21 = vsel %vm339_vm0, %v362_v17, 0  ;;  %v699_v22 = vsel %vm339_vm0, %v363_v18, 0 }
  0x20   : > { %v354_v23 = vld [vmem:[%s2493_s14 + $0x18] sm:$0xf]  ;;  %v355_v24 = vld [vmem:[%s2493_s14 + $0x1c] sm:$0xf]  ;;  %337 = vst.msk [vmem:[#allocation3 + $0x30] sm:$0xff] %vm322_vm2, %v2354_v0  ;;  %338 = vst.msk [vmem:[#allocation3 + $0x38] sm:$0xff] %vm322_vm2, %v2354_v0 }
  0x21   : > { %v2603_v4 = vld [vmem:[#allocation2] sm:$0xff]  ;;  %v2618_v11 = vld [vmem:[#allocation2 + $0x10] sm:$0xff]  ;;  %s2364_s11 = smov 16   ;;  %s290_s14 = sand.u32 1, %s2336_s19  }
  0x22   : > { %v369_v52 = vld [vmem:[%s2646_s17 + $0x14] sm:$0xf]  ;;  %s1973_s15 = sshll.u32 %s290_s14, 3 }
  0x23   : > { %2053 = vmatmul.mubr.msk.bf16.vlgmr.msra.gmra.mrb[0].mxu0 %vm339_vm0, %v348_v7  ;;  %2059 = vmatmul.mubr.msk.bf16.vlgmr.msra.gmra.mrb[0].mxu1 %vm339_vm0, %v349_v8  ;;  %v2608_v7 = vld [vmem:[#allocation2 + $0x8] sm:$0xff] }
  0x24   : > { %2063 = vmatpush3.bf16.xpose.msra.mxu0 %v469_v9  ;;  %2069 = vmatpush3.bf16.xpose.msra.mxu1 %v515_v10 }
  0x25   : > { %2064 = vmatprep.mubr.msk.bf16.mxu0 %vm2355_vm1, %v2354_v0  ;;  %2074 = vmatprep.subr.bf16.mxu0 %v2354_v0 }
  0x26   : > { %2070 = vmatprep.mubr.msk.bf16.mxu1 %vm2355_vm1, %v2354_v0  ;;  %2080 = vmatprep.subr.bf16.mxu1 %v2354_v0 }
  0x2b   : > { %2065 = vmatmul.mubr.msk.bf16.vlgmr.msra.gmra.mrb[4].mxu0 %vm339_vm0, %v350_v13  ;;  %2071 = vmatmul.mubr.msk.bf16.vlgmr.msra.gmra.mrb[4].mxu1 %vm339_vm0, %v351_v14 }
  0x2c   : > { %2075 = vmatpush3.bf16.xpose.msra.mxu0 %v561_v15  ;;  %2081 = vmatpush3.bf16.xpose.msra.mxu1 %v607_v16  ;;  %v2628_v15 = vld [vmem:[#allocation2 + $0x18] sm:$0xff] }
  0x2d   : > { %2076 = vmatprep.mubr.msk.bf16.mxu0 %vm2355_vm1, %v2354_v0  ;;  %2086 = vmatprep.subr.bf16.mxu0 %v2354_v0 }
  0x2e   : > { %2082 = vmatprep.mubr.msk.bf16.mxu1 %vm2355_vm1, %v2354_v0  ;;  %2092 = vmatprep.subr.bf16.mxu1 %v2354_v0 }
  0x33   : > { %2077 = vmatmul.mubr.msk.bf16.vlgmr.msra.gmra.mrb[8].mxu0 %vm339_vm0, %v352_v19  ;;  %2083 = vmatmul.mubr.msk.bf16.vlgmr.msra.gmra.mrb[8].mxu1 %vm339_vm0, %v353_v20  ;;  %v2638_v19 = vld [vmem:[#allocation2 + $0x20] sm:$0xff]  ;;  %v2640_v20 = vld [vmem:[#allocation2 + $0x28] sm:$0xff] }
  0x34   : > { %2087 = vmatpush3.bf16.xpose.msra.mxu0 %v653_v21  ;;  %2093 = vmatpush3.bf16.xpose.msra.mxu1 %v699_v22  ;;  %v364_v22 = vld [vmem:[%s2646_s17] sm:$0xf] }
  0x35   : > { %2088 = vmatprep.mubr.msk.bf16.mxu0 %vm2355_vm1, %v2354_v0  ;;  %2094 = vmatprep.mubr.msk.bf16.mxu1 %vm2355_vm1, %v2354_v0  ;;  %v996_v25 = vsel %vm994_vm4, %v364_v22, 0 }
  0x36   : > { %2098 = vmatprep.subr.bf16.mxu0 %v2354_v0  ;;  %2104 = vmatprep.subr.bf16.mxu1 %v2354_v0 }
  0x3b   : > { %2089 = vmatmul.mubr.msk.bf16.vlgmr.msra.gmra.mrb[12].mxu0 %vm339_vm0, %v354_v23  ;;  %2095 = vmatmul.mubr.msk.bf16.vlgmr.msra.gmra.mrb[12].mxu1 %vm339_vm0, %v355_v24 }
  0x3c   : > { %2100 = vmatprep.mubr.msk.bf16.mxu0 %vm2355_vm1, %v2354_v0  ;;  %2106 = vmatprep.mubr.msk.bf16.mxu1 %vm2355_vm1, %v2354_v0 }
  0x3d   : > { %2099 = vmatpush3.bf16.msra.mxu0 %v996_v25 }
  0x3e   : > { %2110 = vmatprep.subr.bf16.mxu0 %v2354_v0 }
  0xf6   : > { %v2571_v26 = vpop.f32.mrb[0].mxu0  ;;  %v2573_v27 = vpop.f32.mrb[0].mxu1 }
  0xf7   : > { %v2054_v28 = vpop.f32.mrb[1].mxu0  ;;  %v750_v29 = vsel %vm749_vm3, %v2571_v26, -inf  ;;  %v2060_v30 = vpop.f32.mrb[1].mxu1  ;;  %v753_v35 = vsel %vm749_vm3, %v2573_v27, -inf }
  0xf8   : > { %751 = vmax.xlane.f32.xlu0 %v750_v29  ;;  %v416_v31 = vpop.f32.mrb[2].mxu0  ;;  %v462_v32 = vpop.f32.mrb[2].mxu1 }
  0xf9   : > { %v2055_v33 = vpop.f32.mrb[3].mxu0  ;;  %v2061_v34 = vpop.f32.mrb[3].mxu1  ;;  %v365_v32 = vld [vmem:[%s2646_s17 + $0x4] sm:$0xf] }
  0xfa   : > { %v1042_v33 = vsel %vm994_vm4, %v365_v32, 0  ;;  %v2673_v34 = vld [vmem:[#allocation2 + $0x30] sm:$0xff] }
  0xfb   : > { %2105 = vmatpush3.bf16.msra.mxu1 %v1042_v33 }
  0xfc   : > { %754 = vmax.xlane.f32.xlu0 %v753_v35  ;;  %v2675_v35 = vld [vmem:[#allocation2 + $0x38] sm:$0xff]  ;;  %2116 = vmatprep.subr.bf16.mxu1 %v2354_v0 }
  0xfe   : > { %v2579_v36 = vpop.f32.mrb[4].mxu0  ;;  %v2581_v37 = vpop.f32.mrb[4].mxu1 }
  0xff   : > { %v2066_v38 = vpop.f32.mrb[5].mxu0  ;;  %v756_v39 = vsel %vm749_vm3, %v2579_v36, -inf  ;;  %v2072_v40 = vpop.f32.mrb[5].mxu1  ;;  %v759_v45 = vsel %vm749_vm3, %v2581_v37, -inf }
 0x100   : > { %757 = vmax.xlane.f32.xlu1 %v756_v39  ;;  %v508_v41 = vpop.f32.mrb[6].mxu0  ;;  %v554_v42 = vpop.f32.mrb[6].mxu1  ;;  %v366_v38 = vld [vmem:[%s2646_s17 + $0x8] sm:$0xf] }
 0x101   : > { %v2067_v43 = vpop.f32.mrb[7].mxu0  ;;  %v2073_v44 = vpop.f32.mrb[7].mxu1  ;;  %v1088_v41 = vsel %vm994_vm4, %v366_v38, 0 }
 0x104   : > { %760 = vmax.xlane.f32.xlu1 %v759_v45 }
 0x106   : > { %v2587_v46 = vpop.f32.mrb[8].mxu0  ;;  %v2589_v47 = vpop.f32.mrb[8].mxu1 }
 0x107   : > { %v2078_v48 = vpop.f32.mrb[9].mxu0  ;;  %v762_v49 = vsel %vm749_vm3, %v2587_v46, -inf  ;;  %v2084_v50 = vpop.f32.mrb[9].mxu1  ;;  %v765_v51 = vsel %vm749_vm3, %v2589_v47, -inf }
 0x108   : > { %763 = vmax.xlane.f32.xlu0 %v762_v49  ;;  %v600_v53 = vpop.f32.mrb[10].mxu0  ;;  %v646_v54 = vpop.f32.mrb[10].mxu1  ;;  %766 = vmax.xlane.f32.xlu1 %v765_v51  ;;  %v367_v48 = vld [vmem:[%s2646_s17 + $0xc] sm:$0xf]  ;;  %v368_v50 = vld [vmem:[%s2646_s17 + $0x10] sm:$0xf] }
 0x109   : > { %v2079_v55 = vpop.f32.mrb[11].mxu0  ;;  %v2085_v56 = vpop.f32.mrb[11].mxu1  ;;  %v1134_v49 = vsel %vm994_vm4, %v367_v48, 0  ;;  %v1180_v51 = vsel %vm994_vm4, %v368_v50, 0  ;;  %v2703_v53 = vsel %vm994_vm4, %v369_v52, 0 }
 0x10a   : > { %v370_v54 = vld [vmem:[%s2646_s17 + $0x18] sm:$0xf]  ;;  %v371_v56 = vld [vmem:[%s2646_s17 + $0x1c] sm:$0xf] }
 0x10b   : > { %v2707_v55 = vsel %vm994_vm4, %v370_v54, 0 }
 0x10e   : > { %v2595_v57 = vpop.f32.mrb[12].mxu0  ;;  %v2597_v58 = vpop.f32.mrb[12].mxu1 }
 0x10f   : > { %v2090_v59 = vpop.f32.mrb[13].mxu0  ;;  %v768_v60 = vsel %vm749_vm3, %v2595_v57, -inf  ;;  %v2096_v61 = vpop.f32.mrb[13].mxu1  ;;  %v771_v62 = vsel %vm749_vm3, %v2597_v58, -inf }
 0x110   : > { %769 = vmax.xlane.f32.xlu0 %v768_v60  ;;  %v692_v63 = vpop.f32.mrb[14].mxu0  ;;  %v738_v1 = vpop.f32.mrb[14].mxu1  ;;  %772 = vmax.xlane.f32.xlu1 %v771_v62  ;;  %v2711_v59 = vsel %vm994_vm4, %v371_v56, 0 }
 0x111   : > { %v2091_v2 = vpop.f32.mrb[15].mxu0  ;;  %v2097_v3 = vpop.f32.mrb[15].mxu1 }
 0x185   : > { %v752_v5 = vpop.xlane.xlu0 %751 }
 0x186   : > { %v2606_v6 = vmax.f32 %v2603_v4, %v752_v5 }
 0x188   : > { %v782_v8 = vsub.f32 %v2603_v4, %v2606_v6  ;;  %1376 = vst.msk [vmem:[#allocation2] sm:$0xff] %vm322_vm2, %v2606_v6  ;;  %808 = vperm.xlu0 %2222, %v2606_v6  }
 0x189   : > { %v755_v9 = vpop.xlane.xlu0 %754 }
 0x18a   : > { %v2616_v10 = vmax.f32 %v2608_v7, %v755_v9 }
 0x18c   : > { %v783_v12 = vsub.f32 %v2608_v7, %v2616_v10  ;;  %1377 = vst.msk [vmem:[#allocation2 + $0x8] sm:$0xff] %vm322_vm2, %v2616_v10  ;;  %813 = vperm.xlu1 %2223, %v2616_v10  }
 0x18d   : > { %v758_v13 = vpop.xlane.xlu1 %757 }
 0x18e   : > { %v2626_v14 = vmax.f32 %v2618_v11, %v758_v13 }
 0x190   : > { %v784_v16 = vsub.f32 %v2618_v11, %v2626_v14  ;;  %1378 = vst.msk [vmem:[#allocation2 + $0x10] sm:$0xff] %vm322_vm2, %v2626_v14  ;;  %818 = vperm.xlu1 %2223, %v2626_v14  }
 0x191   : > { %v761_v17 = vpop.xlane.xlu1 %760 }
 0x192   : > { %v2636_v18 = vmax.f32 %v2628_v15, %v761_v17 }
 0x194   : > { %v785_v21 = vsub.f32 %v2628_v15, %v2636_v18  ;;  %1379 = vst.msk [vmem:[#allocation2 + $0x18] sm:$0xff] %vm322_vm2, %v2636_v18  ;;  %823 = vperm.xlu1 %2223, %v2636_v18  }
 0x195   : > { %v764_v23 = vpop.xlane.xlu0 %763  ;;  %v767_v24 = vpop.xlane.xlu1 %766 }
 0x196   : > { %v2656_v28 = vmax.f32 %v2638_v19, %v764_v23  ;;  %v2659_v29 = vmax.f32 %v2640_v20, %v767_v24 }
 0x198   : > { %v786_v30 = vsub.f32 %v2638_v19, %v2656_v28  ;;  %1380 = vst.msk [vmem:[#allocation2 + $0x20] sm:$0xff] %vm322_vm2, %v2656_v28  ;;  %828 = vperm.xlu1 %2223, %v2656_v28   ;;  %v787_v31 = vsub.f32 %v2640_v20, %v2659_v29  ;;  %1381 = vst.msk [vmem:[#allocation2 + $0x28] sm:$0xff] %vm322_vm2, %v2659_v29  ;;  %v870_v20 = vld [vmem:[#allocation3] sm:$0xff] }
 0x19a   : > { %v798_v7 = vmul.f32 1.442695, %v786_v30  ;;  %v800_v4 = vmul.f32 1.442695, %v787_v31 }
 0x19c   : > { %833 = vperm.xlu1 %2223, %v2659_v29   ;;  %v871_v29 = vld [vmem:[#allocation3 + $0x8] sm:$0xff] }
 0x19d   : > { %v770_v39 = vpop.xlane.xlu0 %769  ;;  %v773_v40 = vpop.xlane.xlu1 %772 }
 0x19e   : > { %v2682_v42 = vmax.f32 %v2673_v34, %v770_v39  ;;  %v2685_v43 = vmax.f32 %v2675_v35, %v773_v40 }
 0x1a0   : > { %v788_v44 = vsub.f32 %v2673_v34, %v2682_v42  ;;  %1382 = vst.msk [vmem:[#allocation2 + $0x30] sm:$0xff] %vm322_vm2, %v2682_v42  ;;  %838 = vperm.xlu1 %2223, %v2682_v42   ;;  %v789_v45 = vsub.f32 %v2675_v35, %v2685_v43  ;;  %1383 = vst.msk [vmem:[#allocation2 + $0x38] sm:$0xff] %vm322_vm2, %v2685_v43  ;;  %v872_v35 = vld [vmem:[#allocation3 + $0x10] sm:$0xff] }
 0x1a2   : > { %v802_v6 = vmul.f32 1.442695, %v788_v44 }
 0x1a4   : > { %843 = vperm.xlu1 %2223, %v2685_v43  }
 0x207   : > { %v809_v60 = vpop.permute.xlu0 %808 }
 0x208   : > { %v846_v61 = vsub.f32 %v2571_v26, %v809_v60 }
 0x20a   : > { %v854_v62 = vmul.f32 1.442695, %v846_v61 }
 0x20b   : > { %v814_v63 = vpop.permute.xlu1 %813 }
 0x20c   : > { %2226 = vpow2.f32 %v854_v62  ;;  %v847_v1 = vsub.f32 %v2573_v27, %v814_v63 }
 0x20e   : > { %v856_v2 = vmul.f32 1.442695, %v847_v1 }
 0x20f   : > { %v819_v3 = vpop.permute.xlu1 %818 }
 0x210   : > { %2228 = vpow2.f32 %v856_v2  ;;  %v848_v5 = vsub.f32 %v2579_v36, %v819_v3 }
 0x212   : > { %v858_v9 = vmul.f32 1.442695, %v848_v5 }
 0x213   : > { %v824_v13 = vpop.permute.xlu1 %823 }
 0x214   : > { %2230 = vpow2.f32 %v858_v9  ;;  %v849_v17 = vsub.f32 %v2581_v37, %v824_v13 }
 0x216   : > { %v2227_v22 = vpop.eup %2226  ;;  %v860_v23 = vmul.f32 1.442695, %v849_v17  ;;  %v790_v17 = vmul.f32 1.442695, %v782_v8  ;;  %v804_v8 = vmul.f32 1.442695, %v789_v45 }
 0x217   : > { %v829_v24 = vpop.permute.xlu1 %828  ;;  %v886_v26 = vsel %vm749_vm3, %v2227_v22, 0.0  ;;  %v983_v25 = vpack.c.bf16 %v2227_v22, %v2227_v22  ;;  %v794_v22 = vmul.f32 1.442695, %v784_v16  ;;  %v873_v45 = vld [vmem:[#allocation3 + $0x18] sm:$0xff] }
 0x218   : > { %2232 = vpow2.f32 %v860_v23  ;;  %v850_v32 = vsub.f32 %v2587_v46, %v829_v24  ;;  %887 = vadd.xlane.f32.xlu1 %v886_v26  ;;  %v796_v23 = vmul.f32 1.442695, %v785_v21 }
 0x219   : > { %2101 = vmatmul.mubr.msk.bf16.vlgmr.msra.gmra.mrb[16].mxu0 %vm749_vm3, %v983_v25 }
 0x21a   : > { %v2229_v27 = vpop.eup %2228  ;;  %v862_v33 = vmul.f32 1.442695, %v850_v32  ;;  %2111 = vmatpush3.bf16.msra.mxu0 %v1088_v41  ;;  %2112 = vmatprep.mubr.msk.bf16.mxu0 %vm2355_vm1, %v2354_v0 }
 0x21b   : > { %v834_v36 = vpop.permute.xlu1 %833  ;;  %v889_v37 = vsel %vm749_vm3, %v2229_v27, 0.0  ;;  %v984_v38 = vpack.c.bf16 %v2229_v27, %v2229_v27  ;;  %2122 = vmatprep.subr.bf16.mxu0 %v2354_v0  ;;  %v874_v27 = vld [vmem:[#allocation3 + $0x20] sm:$0xff] }
 0x21c   : > { %2234 = vpow2.f32 %v862_v33  ;;  %v851_v39 = vsub.f32 %v2589_v47, %v834_v36  ;;  %890 = vadd.xlane.f32.xlu0 %v889_v37 }
 0x21d   : > { %2107 = vmatmul.mubr.msk.bf16.vlgmr.msra.gmra.mrb[16].mxu1 %vm749_vm3, %v984_v38 }
 0x21e   : > { %v2231_v46 = vpop.eup %2230  ;;  %v864_v40 = vmul.f32 1.442695, %v851_v39  ;;  %2117 = vmatpush3.bf16.msra.mxu1 %v1134_v49  ;;  %2118 = vmatprep.mubr.msk.bf16.mxu1 %vm2355_vm1, %v2354_v0  ;;  %v875_v39 = vld [vmem:[#allocation3 + $0x28] sm:$0xff] }
 0x21f   : > { %v839_v41 = vpop.permute.xlu1 %838  ;;  %v892_v48 = vsel %vm749_vm3, %v2231_v46, 0.0  ;;  %v985_v50 = vpack.c.bf16 %v2231_v46, %v2231_v46  ;;  %2128 = vmatprep.subr.bf16.mxu1 %v2354_v0 }
 0x220   : > { %2236 = vpow2.f32 %v864_v40  ;;  %v852_v52 = vsub.f32 %v2595_v57, %v839_v41  ;;  %893 = vadd.xlane.f32.xlu0 %v892_v48 }
 0x221   : > { %2113 = vmatmul.mubr.msk.bf16.vlgmr.msra.gmra.mrb[20].mxu0 %vm749_vm3, %v985_v50  ;;  %v876_v50 = vld [vmem:[#allocation3 + $0x30] sm:$0xff] }
 0x222   : > { %v2233_v47 = vpop.eup %2232  ;;  %v866_v54 = vmul.f32 1.442695, %v852_v52  ;;  %2123 = vmatpush3.bf16.msra.mxu0 %v1180_v51  ;;  %2124 = vmatprep.mubr.msk.bf16.mxu0 %vm2355_vm1, %v2354_v0 }
 0x223   : > { %v844_v49 = vpop.permute.xlu1 %843  ;;  %v895_v56 = vsel %vm749_vm3, %v2233_v47, 0.0  ;;  %v986_v60 = vpack.c.bf16 %v2233_v47, %v2233_v47  ;;  %2134 = vmatprep.subr.bf16.mxu0 %v2354_v0 }
 0x224   : > { %2238 = vpow2.f32 %v866_v54  ;;  %v853_v61 = vsub.f32 %v2597_v58, %v844_v49  ;;  %896 = vadd.xlane.f32.xlu1 %v895_v56  ;;  %v877_v56 = vld [vmem:[#allocation3 + $0x38] sm:$0xff] }
 0x225   : > { %2119 = vmatmul.mubr.msk.bf16.vlgmr.msra.gmra.mrb[20].mxu1 %vm749_vm3, %v986_v60 }
 0x226   : > { %v2235_v57 = vpop.eup %2234  ;;  %v868_v62 = vmul.f32 1.442695, %v853_v61  ;;  %2129 = vmatpush3.bf16.msra.mxu1 %v2703_v53  ;;  %2130 = vmatprep.mubr.msk.bf16.mxu1 %vm2355_vm1, %v2354_v0 }
 0x227   : > { %v898_v51 = vsel %vm749_vm3, %v2235_v57, 0.0  ;;  %v987_v63 = vpack.c.bf16 %v2235_v57, %v2235_v57  ;;  %2140 = vmatprep.subr.bf16.mxu1 %v2354_v0 }
 0x228   : > { %2240 = vpow2.f32 %v868_v62  ;;  %899 = vadd.xlane.f32.xlu0 %v898_v51 }
 0x229   : > { %2125 = vmatmul.mubr.msk.bf16.vlgmr.msra.gmra.mrb[24].mxu0 %vm749_vm3, %v987_v63 }
 0x22a   : > { %v2237_v58 = vpop.eup %2236  ;;  %2135 = vmatpush3.bf16.msra.mxu0 %v2707_v55  ;;  %2136 = vmatprep.mubr.msk.bf16.mxu0 %vm2355_vm1, %v2354_v0 }
 0x22b   : > { %v901_v53 = vsel %vm749_vm3, %v2237_v58, 0.0  ;;  %v988_v1 = vpack.c.bf16 %v2237_v58, %v2237_v58  ;;  %2146 = vmatprep.subr.bf16.mxu0 %v2354_v0 }
 0x22c   : > { %902 = vadd.xlane.f32.xlu1 %v901_v53 }
 0x22d   : > { %2131 = vmatmul.mubr.msk.bf16.vlgmr.msra.gmra.mrb[24].mxu1 %vm749_vm3, %v988_v1  ;;  %v927_v1 = vld [vmem:[#allocation4] sm:$0xff] }
 0x22e   : > { %v2239_v2 = vpop.eup %2238  ;;  %2141 = vmatpush3.bf16.msra.mxu1 %v2711_v59  ;;  %2142 = vmatprep.mubr.msk.bf16.mxu1 %vm2355_vm1, %v2354_v0  ;;  %v792_v59 = vmul.f32 1.442695, %v783_v12 }
 0x22f   : > { %v904_v3 = vsel %vm749_vm3, %v2239_v2, 0.0  ;;  %v989_v55 = vpack.c.bf16 %v2239_v2, %v2239_v2 }
 0x230   : > { %905 = vadd.xlane.f32.xlu0 %v904_v3  ;;  %2242 = vpow2.f32 %v792_v59 }
 0x231   : > { %2137 = vmatmul.mubr.msk.bf16.vlgmr.msra.gmra.mrb[28].mxu0 %vm749_vm3, %v989_v55  ;;  %2244 = vpow2.f32 %v790_v17 }
 0x232   : > { %v2241_v5 = vpop.eup %2240  ;;  %2150 = vmatprep.mubr.msk.bf16.mxu0 %vm2355_vm1, %v2354_v0  ;;  %2246 = vpow2.f32 %v794_v22 }
 0x233   : > { %v907_v9 = vsel %vm749_vm3, %v2241_v5, 0.0  ;;  %v990_v13 = vpack.c.bf16 %v2241_v5, %v2241_v5  ;;  %2248 = vpow2.f32 %v796_v23  ;;  %v928_v5 = vld [vmem:[#allocation4 + $0x8] sm:$0xff] }
 0x234   : > { %908 = vadd.xlane.f32.xlu1 %v907_v9  ;;  %2250 = vpow2.f32 %v798_v7  ;;  %v929_v7 = vld [vmem:[#allocation4 + $0x10] sm:$0xff] }
 0x235   : > { %2143 = vmatmul.mubr.msk.bf16.vlgmr.msra.gmra.mrb[28].mxu1 %vm749_vm3, %v990_v13  ;;  %2252 = vpow2.f32 %v800_v4 }
 0x236   : > { %2254 = vpow2.f32 %v802_v6 }
 0x237   : > { %2256 = vpow2.f32 %v804_v8 }
 0x23a   : > { %v2243_v10 = vpop.eup %2242 }
 0x23b   : > { %v2245_v11 = vpop.eup %2244  ;;  %v879_v31 = vmul.f32 %v2243_v10, %v871_v29 }
 0x23c   : > { %v2247_v12 = vpop.eup %2246  ;;  %v878_v21 = vmul.f32 %v2245_v11, %v870_v20 }
 0x23d   : > { %v2249_v14 = vpop.eup %2248  ;;  %v880_v43 = vmul.f32 %v2247_v12, %v872_v35 }
 0x23e   : > { %v2251_v15 = vpop.eup %2250  ;;  %v881_v25 = vmul.f32 %v2249_v14, %v873_v45 }
 0x23f   : > { %v2253_v16 = vpop.eup %2252  ;;  %v882_v37 = vmul.f32 %v2251_v15, %v874_v27 }
 0x240   : > { %v2255_v18 = vpop.eup %2254  ;;  %v883_v41 = vmul.f32 %v2253_v16, %v875_v39 }
 0x241   : > { %v2257_v19 = vpop.eup %2256  ;;  %v884_v54 = vmul.f32 %v2255_v18, %v876_v50 }
 0x242   : > { %v885_v57 = vmul.f32 %v2257_v19, %v877_v56 }
 0x245   : > { %942 = vperm.xlu1 %2223, %v2243_v10  }
 0x246   : > { %937 = vperm.xlu0 %2222, %v2245_v11  }
 0x249   : > { %947 = vperm.xlu1 %2223, %v2247_v12  }
 0x24a   : > { %952 = vperm.xlu0 %2222, %v2249_v14  }
 0x24d   : > { %957 = vperm.xlu1 %2223, %v2251_v15   ;;  %v930_v15 = vld [vmem:[#allocation4 + $0x18] sm:$0xff] }
 0x24e   : > { %962 = vperm.xlu0 %2222, %v2253_v16  }
 0x251   : > { %967 = vperm.xlu1 %2223, %v2255_v18  }
 0x252   : > { %972 = vperm.xlu0 %2222, %v2257_v19  }
 0x2a5   : > { %v888_v28 = vpop.xlane.xlu1 %887 }
 0x2a6   : > { %v910_v30 = vadd.f32 %v888_v28, %v878_v21 }
 0x2a8   : > { %919 = vst.msk [vmem:[#allocation3] sm:$0xff] %vm322_vm2, %v910_v30  ;;  %v931_v30 = vld [vmem:[#allocation4 + $0x20] sm:$0xff] }
 0x2a9   : > { %v891_v34 = vpop.xlane.xlu0 %890 }
 0x2aa   : > { %v911_v42 = vadd.f32 %v891_v34, %v879_v31 }
 0x2ac   : > { %920 = vst.msk [vmem:[#allocation3 + $0x8] sm:$0xff] %vm322_vm2, %v911_v42 }
 0x2ad   : > { %v894_v44 = vpop.xlane.xlu0 %893 }
 0x2ae   : > { %v912_v24 = vadd.f32 %v894_v44, %v880_v43 }
 0x2af   : > { %v1395_v26 = vld [vmem:[#allocation3] sm:$0xff] }
 0x2b0   : > { %921 = vst.msk [vmem:[#allocation3 + $0x10] sm:$0xff] %vm322_vm2, %v912_v24  ;;  %1405 = vperm.xlu1 %2223, %v1395_v26   ;;  %v932_v24 = vld [vmem:[#allocation4 + $0x28] sm:$0xff] }
 0x2b1   : > { %v897_v32 = vpop.xlane.xlu1 %896 }
 0x2b2   : > { %v913_v33 = vadd.f32 %v897_v32, %v881_v25 }
 0x2b3   : > { %v1396_v36 = vld [vmem:[#allocation3 + $0x8] sm:$0xff] }
 0x2b4   : > { %922 = vst.msk [vmem:[#allocation3 + $0x18] sm:$0xff] %vm322_vm2, %v913_v33  ;;  %1410 = vperm.xlu0 %2222, %v1396_v36  }
 0x2b5   : > { %v900_v38 = vpop.xlane.xlu0 %899 }
 0x2b6   : > { %v914_v46 = vadd.f32 %v900_v38, %v882_v37  ;;  %v933_v38 = vld [vmem:[#allocation4 + $0x30] sm:$0xff] }
 0x2b7   : > { %v1397_v40 = vld [vmem:[#allocation3 + $0x10] sm:$0xff] }
 0x2b8   : > { %923 = vst.msk [vmem:[#allocation3 + $0x20] sm:$0xff] %vm322_vm2, %v914_v46  ;;  %1415 = vperm.xlu1 %2223, %v1397_v40  }
 0x2b9   : > { %v903_v48 = vpop.xlane.xlu1 %902 }
 0x2ba   : > { %v915_v52 = vadd.f32 %v903_v48, %v883_v41 }
 0x2bb   : > { %v1398_v47 = vld [vmem:[#allocation3 + $0x18] sm:$0xff] }
 0x2bc   : > { %924 = vst.msk [vmem:[#allocation3 + $0x28] sm:$0xff] %vm322_vm2, %v915_v52  ;;  %1420 = vperm.xlu0 %2222, %v1398_v47   ;;  %v934_v47 = vld [vmem:[#allocation4 + $0x38] sm:$0xff] }
 0x2bd   : > { %v906_v49 = vpop.xlane.xlu0 %905 }
 0x2be   : > { %v916_v60 = vadd.f32 %v906_v49, %v884_v54 }
 0x2bf   : > { %v1399_v61 = vld [vmem:[#allocation3 + $0x20] sm:$0xff] }
 0x2c0   : > { %925 = vst.msk [vmem:[#allocation3 + $0x30] sm:$0xff] %vm322_vm2, %v916_v60  ;;  %1425 = vperm.xlu1 %2223, %v1399_v61  }
 0x2c1   : > { %v909_v62 = vpop.xlane.xlu1 %908 }
 0x2c2   : > { %v917_v51 = vadd.f32 %v909_v62, %v885_v57 }
 0x2c3   : > { %v1400_v63 = vld [vmem:[#allocation3 + $0x28] sm:$0xff] }
 0x2c4   : > { %926 = vst.msk [vmem:[#allocation3 + $0x38] sm:$0xff] %vm322_vm2, %v917_v51  ;;  %1430 = vperm.xlu0 %2222, %v1400_v63  }
 0x2c5   : > { %v938_v2 = vpop.permute.xlu0 %937  ;;  %v943_v3 = vpop.permute.xlu1 %942 }
 0x2c6   : > { %v975_v55 = vmul.f32 %v938_v2, %v927_v1  ;;  %v976_v22 = vmul.f32 %v943_v3, %v928_v5 }
 0x2c7   : > { %v1401_v58 = vld [vmem:[#allocation3 + $0x30] sm:$0xff] }
 0x2c8   : > { %1435 = vperm.xlu1 %2223, %v1401_v58  }
 0x2c9   : > { %v948_v4 = vpop.permute.xlu1 %947  ;;  %v953_v16 = vpop.permute.xlu0 %952 }
 0x2ca   : > { %v977_v12 = vmul.f32 %v948_v4, %v929_v7  ;;  %v978_v28 = vmul.f32 %v953_v16, %v930_v15 }
 0x2cb   : > { %v1402_v53 = vld [vmem:[#allocation3 + $0x38] sm:$0xff] }
 0x2cc   : > { %1440 = vperm.xlu0 %2222, %v1402_v53  }
 0x2cd   : > { %v958_v31 = vpop.permute.xlu1 %957  ;;  %v963_v26 = vpop.permute.xlu0 %962 }
 0x2ce   : > { %v979_v44 = vmul.f32 %v958_v31, %v931_v30  ;;  %v980_v36 = vmul.f32 %v963_v26, %v932_v24 }
 0x2d1   : > { %v968_v39 = vpop.permute.xlu1 %967  ;;  %v973_v54 = vpop.permute.xlu0 %972 }
 0x2d2   : > { %v981_v50 = vmul.f32 %v968_v39, %v933_v38  ;;  %v982_v57 = vmul.f32 %v973_v54, %v934_v47 }
 0x2ec   : > { %v1032_v9 = vpop.f32.mrb[16].mxu0 }
 0x2ed   : > { %v1360_v13 = vadd.f32 %v1032_v9, %v975_v55  ;;  %v2102_v59 = vpop.f32.mrb[17].mxu0  ;;  %v2358_v9 = vmov 1983009808  }
 0x2ee   : > { %v1035_v17 = vpop.f32.mrb[18].mxu0  ;;  %v1464_v59 = vlaneseq }
 0x2ef   : > { %1368 = vst.msk [vmem:[#allocation4] sm:$0xff] %vm339_vm0, %v1360_v13  ;;  %v2103_v23 = vpop.f32.mrb[19].mxu0  ;;  %v1462_v13 = vunpack.c.l.s4 %v2358_v9 }
 0x2f0   : > { %v1078_v6 = vpop.f32.mrb[16].mxu1  ;;  %v1465_v7 = vshrl.u32 %v1464_v59, 7 }
 0x2f1   : > { %v1361_v8 = vadd.f32 %v1078_v6, %v976_v22  ;;  %v2108_v10 = vpop.f32.mrb[17].mxu1  ;;  %v1463_v23 = vunpack.c.0.s8 %v1462_v13  ;;  %v2359_v6 = vmov 1934713408  }
 0x2f2   : > { %v1081_v11 = vpop.f32.mrb[18].mxu1 }
 0x2f3   : > { %1369 = vst.msk [vmem:[#allocation4 + $0x8] sm:$0xff] %vm339_vm0, %v1361_v8  ;;  %v2109_v14 = vpop.f32.mrb[19].mxu1  ;;  %v1526_v8 = vunpack.c.l.s4 %v2359_v6 }
 0x2f4   : > { %v1124_v18 = vpop.f32.mrb[20].mxu0 }
 0x2f5   : > { %v1362_v19 = vadd.f32 %v1124_v18, %v977_v12  ;;  %v2114_v20 = vpop.f32.mrb[21].mxu0 }
 0x2f6   : > { %v1127_v21 = vpop.f32.mrb[22].mxu0  ;;  %v1387_v14 = vld [vmem:[#allocation4] sm:$0xff]  ;;  %v2799_v20 = vsub.s32 %v1463_v23, %v1465_v7 }
 0x2f7   : > { %1370 = vst.msk [vmem:[#allocation4 + $0x10] sm:$0xff] %vm339_vm0, %v1362_v19  ;;  %v2115_v29 = vpop.f32.mrb[23].mxu0 }
 0x2f8   : > { %v1170_v34 = vpop.f32.mrb[20].mxu1  ;;  %v1527_v29 = vunpack.c.0.s8 %v1526_v8 }
 0x2f9   : > { %v1363_v35 = vadd.f32 %v1170_v34, %v978_v28  ;;  %v2120_v42 = vpop.f32.mrb[21].mxu1 }
 0x2fa   : > { %v1173_v43 = vpop.f32.mrb[22].mxu1  ;;  %v1388_v16 = vld [vmem:[#allocation4 + $0x8] sm:$0xff] }
 0x2fb   : > { %1371 = vst.msk [vmem:[#allocation4 + $0x18] sm:$0xff] %vm339_vm0, %v1363_v35  ;;  %v2121_v45 = vpop.f32.mrb[23].mxu1 }
 0x2fc   : > { %v1216_v25 = vpop.f32.mrb[24].mxu0 }
 0x2fd   : > { %v1364_v32 = vadd.f32 %v1216_v25, %v979_v44  ;;  %v2126_v27 = vpop.f32.mrb[25].mxu0  ;;  %v2801_v44 = vsub.s32 %v1527_v29, %v1465_v7 }
 0x2fe   : > { %v1219_v33 = vpop.f32.mrb[26].mxu0  ;;  %v1389_v4 = vld [vmem:[#allocation4 + $0x10] sm:$0xff] }
 0x2ff   : > { %1372 = vst.msk [vmem:[#allocation4 + $0x20] sm:$0xff] %vm339_vm0, %v1364_v32  ;;  %v2127_v37 = vpop.f32.mrb[27].mxu0 }
 0x300   : > { %v1262_v46 = vpop.f32.mrb[24].mxu1 }
 0x301   : > { %v1365_v40 = vadd.f32 %v1262_v46, %v980_v36  ;;  %v2132_v41 = vpop.f32.mrb[25].mxu1 }
 0x302   : > { %v1265_v48 = vpop.f32.mrb[26].mxu1  ;;  %v1390_v21 = vld [vmem:[#allocation4 + $0x18] sm:$0xff] }
 0x303   : > { %1373 = vst.msk [vmem:[#allocation4 + $0x28] sm:$0xff] %vm339_vm0, %v1365_v40  ;;  %v2133_v52 = vpop.f32.mrb[27].mxu1 }
 0x304   : > { %v1308_v49 = vpop.f32.mrb[28].mxu0 }
 0x305   : > { %v1366_v56 = vadd.f32 %v1308_v49, %v981_v50  ;;  %v2138_v60 = vpop.f32.mrb[29].mxu0 }
 0x306   : > { %v1311_v61 = vpop.f32.mrb[30].mxu0 }
 0x307   : > { %1374 = vst.msk [vmem:[#allocation4 + $0x30] sm:$0xff] %vm339_vm0, %v1366_v56  ;;  %v2139_v62 = vpop.f32.mrb[31].mxu0 }
 0x308   : > { %v1354_v51 = vpop.f32.mrb[28].mxu1  ;;  %v1391_v62 = vld [vmem:[#allocation4 + $0x20] sm:$0xff] }
 0x309   : > { %v1367_v63 = vadd.f32 %v1354_v51, %v982_v57  ;;  %v2144_v58 = vpop.f32.mrb[29].mxu1 }
 0x30a   : > { %v1357_v53 = vpop.f32.mrb[30].mxu1 }
 0x30b   : > { %1375 = vst.msk [vmem:[#allocation4 + $0x38] sm:$0xff] %vm339_vm0, %v1367_v63  ;;  %v2145_v1 = vpop.f32.mrb[31].mxu1  ;;  %v1392_v53 = vld [vmem:[#allocation4 + $0x28] sm:$0xff] }
 0x30e   : > { %v1393_v47 = vld [vmem:[#allocation4 + $0x30] sm:$0xff] }
 0x32f   : > { %v1406_v2 = vpop.permute.xlu1 %1405 }
 0x330   : > { %2258 = vrcp.f32 %v1406_v2 }
 0x333   : > { %v1411_v3 = vpop.permute.xlu0 %1410 }
 0x337   : > { %v1416_v55 = vpop.permute.xlu1 %1415 }
 0x338   : > { %2260 = vrcp.f32 %v1416_v55 }
 0x339   : > { %2262 = vrcp.f32 %v1411_v3 }
 0x33a   : > { %v2259_v17 = vpop.eup %2258 }
 0x33b   : > { %v1421_v5 = vpop.permute.xlu0 %1420  ;;  %v1444_v15 = vmul.f32 %v2259_v17, %v1387_v14 }
 0x33c   : > { %2264 = vrcp.f32 %v1421_v5  ;;  %v1394_v5 = vld [vmem:[#allocation4 + $0x38] sm:$0xff] }
 0x33f   : > { %v1426_v12 = vpop.permute.xlu1 %1425 }
 0x340   : > { %2266 = vrcp.f32 %v1426_v12 }
 0x342   : > { %v2261_v22 = vpop.eup %2260 }
 0x343   : > { %v2263_v10 = vpop.eup %2262  ;;  %v1448_v11 = vmul.f32 %v2261_v22, %v1389_v4  ;;  %v1431_v28 = vpop.permute.xlu0 %1430 }
 0x344   : > { %v1446_v19 = vmul.f32 %v2263_v10, %v1388_v16 }
 0x345   : > { %v1459_v30 = vcombine.low %v1444_v15, %v1448_v11  ;;  %v1460_v31 = vcombine.high %v1444_v15, %v1448_v11 }
 0x346   : > { %v2265_v18 = vpop.eup %2264 }
 0x347   : > { %v1450_v34 = vmul.f32 %v2265_v18, %v1390_v21  ;;  %v1436_v35 = vpop.permute.xlu1 %1435  ;;  %v1467_v45 = vrot.slane %v1459_v30, %v2799_v20  ;;  %v1474_v24 = vrot.slane %v1460_v31, %v2799_v20 }
 0x348   : > { %2268 = vrcp.f32 %v1436_v35 }
 0x349   : > { %v1475_v42 = vcombine.low %v1446_v19, %v1450_v34  ;;  %v1476_v43 = vcombine.high %v1446_v19, %v1450_v34  ;;  %2270 = vrcp.f32 %v1431_v28  ;;  %v2224_v34 = vld [vmem:[%s2908_s3] sm:$0xff]  }
 0x34a   : > { %v2267_v41 = vpop.eup %2266  ;;  %2147 = vmatpush3.bf16.msra.mxu0 %v2224_v34 }
 0x34b   : > { %v1483_v26 = vrot.slane %v1475_v42, %v2799_v20  ;;  %v1490_v25 = vrot.slane %v1476_v43, %v2799_v20  ;;  %v1441_v32 = vpop.permute.xlu0 %1440  ;;  %v1452_v58 = vmul.f32 %v2267_v41, %v1391_v62  ;;  %2148 = vmatprep.subr.bf16.mxu0 %v2354_v0 }
 0x34c   : > { %2272 = vrcp.f32 %v1441_v32 }
 0x34d   : > { %v1523_v27 = vcombine.low %v1467_v45, %v1483_v26  ;;  %v1524_v33 = vcombine.high %v1467_v45, %v1483_v26  ;;  %v1539_v36 = vcombine.low %v1474_v24, %v1490_v25  ;;  %v1540_v37 = vcombine.high %v1474_v24, %v1490_v25 }
 0x34f   : > { %v1531_v38 = vrot.slane %v1523_v27, %v2801_v44  ;;  %v1538_v39 = vrot.slane %v1524_v33, %v2801_v44  ;;  %v1547_v46 = vrot.slane %v1539_v36, %v2801_v44  ;;  %v1554_v40 = vrot.slane %v1540_v37, %v2801_v44  ;;  %v2225_v27 = vld [vmem:[%s2908_s3 + $0x8] sm:$0xff]  }
 0x350   : > { %2149 = vmatpush3.bf16.msra.mxu0 %v2225_v27 }
 0x351   : > { %v1996_v48 = vcombine.low %v1531_v38, %v1538_v39  ;;  %v1998_v50 = vcombine.high %v1531_v38, %v1538_v39  ;;  %v2000_v54 = vcombine.low %v1547_v46, %v1554_v40  ;;  %v2002_v49 = vcombine.high %v1547_v46, %v1554_v40 }
 0x352   : > { %v2269_v52 = vpop.eup %2268 }
 0x353   : > { %v2271_v56 = vpop.eup %2270  ;;  %v1456_v60 = vmul.f32 %v2269_v52, %v1393_v47  ;;  %v1603_v61 = vrot.slane %v1996_v48, %v2799_v20  ;;  %v1619_v57 = vrot.slane %v1998_v50, %v2799_v20  ;;  %v1635_v51 = vrot.slane %v2000_v54, %v2799_v20 }
 0x354   : > { %v1651_v63 = vrot.slane %v2002_v49, %v2799_v20  ;;  %v1454_v55 = vmul.f32 %v2271_v56, %v1392_v53 }
 0x355   : > { %v1660_v1 = vcombine.high %v1603_v61, %v1619_v57  ;;  %v1659_v2 = vcombine.low %v1603_v61, %v1619_v57  ;;  %v1491_v59 = vcombine.low %v1452_v58, %v1456_v60  ;;  %v1492_v17 = vcombine.high %v1452_v58, %v1456_v60 }
 0x356   : > { %v2273_v3 = vpop.eup %2272  ;;  %v1692_v9 = vcombine.high %v1635_v51, %v1651_v63  ;;  %v1691_v13 = vcombine.low %v1635_v51, %v1651_v63 }
 0x357   : > { %v1458_v22 = vmul.f32 %v2273_v3, %v1394_v5  ;;  %v1674_v23 = vrot.slane %v1660_v1, %v2801_v44  ;;  %v2818_v4 = vrot.slane %v1659_v2, %v2801_v44  ;;  %v1499_v15 = vrot.slane %v1491_v59, %v2799_v20 }
 0x358   : > { %v1706_v7 = vrot.slane %v1692_v9, %v2801_v44  ;;  %v1699_v6 = vrot.slane %v1691_v13, %v2801_v44  ;;  %v1506_v16 = vrot.slane %v1492_v17, %v2799_v20  ;;  %v2004_v9 = vld [vmem:[%s2909_s4] ss:$0 sm:$0xff] }
 0x359   : > { %v1507_v8 = vcombine.low %v1454_v55, %v1458_v22  ;;  %v1508_v10 = vcombine.high %v1454_v55, %v1458_v22 }
 0x35a   : > { %v1725_v11 = vcombine.low %v1674_v23, %v1706_v7  ;;  %v1724_v12 = vcombine.high %v2818_v4, %v1699_v6  ;;  %v1723_v14 = vcombine.low %v2818_v4, %v1699_v6  ;;  %v1726_v31 = vcombine.high %v1674_v23, %v1706_v7 }
 0x35b   : > { %v1515_v18 = vrot.slane %v1507_v8, %v2799_v20  ;;  %v1522_v19 = vrot.slane %v1508_v10, %v2799_v20 }
 0x35c   : > { %1736 = vrot.lane.b32.xlu0 %v1725_v11, %s2360_s24  ;;  %1732 = vrot.lane.b32.xlu1 %v1724_v12, %s2361_s25  ;;  %s2009_s24 = sshll.u32 %s2344_s21, 7  ;;  %s292_s25 = scalar_lea.vmem [#allocation5], %s1973_s15 }
 0x35d   : > { %v1555_v21 = vcombine.low %v1499_v15, %v1515_v18  ;;  %v1556_v28 = vcombine.high %v1499_v15, %v1515_v18  ;;  %v1571_v29 = vcombine.low %v1506_v16, %v1522_v19  ;;  %v1572_v30 = vcombine.high %v1506_v16, %v1522_v19  ;;  %s1855_s27 = sshll.u32 %s292_s25, 4  ;;  %s2857_s8 = scalar_lea.hbm %s2910_s5, %s2009_s24  ;;  %s2859_s27 = int_to_ptr.vmem [resolvable:$true] %s1855_s27 }
 0x35e   : > { %s1841_s21 = scalar_lea.sflag [#allocation6], %s290_s14  ;;  %s2274_s9 = scalar_lea.vmem %s2859_s27, 128 }
 0x35f   : > { %v1563_v35 = vrot.slane %v1555_v21, %v2801_v44  ;;  %v1570_v42 = vrot.slane %v1556_v28, %v2801_v44  ;;  %v1579_v43 = vrot.slane %v1571_v29, %v2801_v44  ;;  %v1586_v45 = vrot.slane %v1572_v30, %v2801_v44  ;;  %p2275_p12 = scmp.ne.s32.totalorder %s2859_s27, %s2274_s9 }
 0x360   : > { %1740 = vrot.lane.b32.xlu1 %v1726_v31, %s2362_s7 }
 0x361   : > { %v1997_v24 = vcombine.low %v1563_v35, %v1570_v42  ;;  %v1999_v26 = vcombine.high %v1563_v35, %v1570_v42  ;;  %v2001_v25 = vcombine.low %v1579_v43, %v1586_v45  ;;  %v2003_v32 = vcombine.high %v1579_v43, %v1586_v45  ;;  %p2276_p13 = pnand %p2275_p12, %p2438_p4 }
 0x363   : > { %v1610_v33 = vrot.slane %v1997_v24, %v2799_v20  ;;  %v1626_v36 = vrot.slane %v1999_v26, %v2799_v20  ;;  %v1642_v37 = vrot.slane %v2001_v25, %v2799_v20  ;;  %v1658_v38 = vrot.slane %v2003_v32, %v2799_v20  ;;  %p2277_p0 = pneg %p2276_p13 }
 0x365   : > { %v1675_v39 = vcombine.low %v1610_v33, %v1626_v36  ;;  %v1707_v46 = vcombine.low %v1642_v37, %v1658_v38  ;;  %v1676_v40 = vcombine.high %v1610_v33, %v1626_v36  ;;  %v1708_v41 = vcombine.high %v1642_v37, %v1658_v38 }
 0x367   : > { %v1683_v48 = vrot.slane %v1675_v39, %v2801_v44  ;;  %v1715_v0 = vrot.slane %v1707_v46, %v2801_v44  ;;  %v1690_v47 = vrot.slane %v1676_v40, %v2801_v44  ;;  %v1722_v54 = vrot.slane %v1708_v41, %v2801_v44 }
 0x369   : > { %v1728_v50 = vcombine.high %v1683_v48, %v1715_v0  ;;  %v1727_v52 = vcombine.low %v1683_v48, %v1715_v0  ;;  %v1730_v20 = vcombine.high %v1690_v47, %v1722_v54  ;;  %v1729_v49 = vcombine.low %v1690_v47, %v1722_v54 }
 0x36b   : > { %1748 = vrot.lane.b32.xlu1 %v1728_v50, %s2363_s10  ;;  %1744 = vrot.lane.b32.xlu0 %v1727_v52, %s2364_s11  ;;  %s2367_s10 = smov [#allocation5]  }
 0x36c   : > { %s2278_s11 = sshll.u32 %s2367_s10, 4  ;;  %s2279_s11 = int_to_ptr.vmem [resolvable:$false] %s2278_s11 }
 0x36d   : > { %p2281_p1 = scmp.lt.s32.totalorder %s2859_s27, %s2279_s11 }
 0x36f   : > { %1756 = vrot.lane.b32.xlu1 %v1730_v20, %s2365_s12  ;;  %1752 = vrot.lane.b32.xlu0 %v1729_v49, %s2366_s13  ;;  %s2280_s12 = scalar_lea.vmem %s2279_s11, 256 }
 0x370   : > { %p2282_p2 = scmp.lt.s32.totalorder %s2280_s12, %s2274_s9 }
 0x372   : > { %p2283_p3 = por %p2282_p2, %p2281_p1 }
 0x374   : > { %p2284_p5 = pnand %p2283_p3, %p2277_p0 }
 0x3ce   : > { %v1733_v56 = vpop.permute.xlu1 %1732  ;;  %v1737_v60 = vpop.permute.xlu0 %1736 }
 0x3cf   : > { %v1759_v61 = vsel %vm339_vm0, %v1723_v14, %v1733_v56 }
 0x3d0   : > { %v1760_v62 = vsel %vm749_vm3, %v1759_v61, %v1737_v60 }
 0x3d2   : > { %v1741_v57 = vpop.permute.xlu1 %1740 }
 0x3d3   : > { %v1762_v44 = vsel %vm1761_vm5, %v1760_v62, %v1741_v57 }
 0x3dd   : > { %v1749_v51 = vpop.permute.xlu1 %1748  ;;  %v1745_v63 = vpop.permute.xlu0 %1744 }
 0x3de   : > { %v1764_v58 = vsel %vm1763_vm6, %v1762_v44, %v1745_v63 }
 0x3df   : > { %v1766_v1 = vsel %vm1765_vm7, %v1764_v58, %v1749_v51 }
 0x3e1   : > { %v1757_v53 = vpop.permute.xlu1 %1756  ;;  %v1753_v2 = vpop.permute.xlu0 %1752 }
 0x3e2   : > { %v1768_v3 = vsel %vm1767_vm8, %v1766_v1, %v1753_v2 }
 0x3e3   : > { %v1770_v55 = vsel %vm1769_vm9, %v1768_v3, %v1757_v53 }
 0x3e4   : > { %v1771_v5 = vpack.c.bf16 %v1770_v55, %v1770_v55 }
 0x3e6   : > { %2151 = vmatmul.mubr.msk.bf16.vlgmr.msra.gmra.mrb[32].mxu0 %vm1795_vm10, %v1771_v5 }
 0x4b9   : > { %v1833_v13 = vpop.f32.mrb[32].mxu0 }
 0x4ba   : > { %v1834_v59 = vadd.f32 %v2004_v9, %v1833_v13  ;;  %v2152_v17 = vpop.f32.mrb[33].mxu0 }
 0x4bb   : > { %v1836_v22 = vpop.f32.mrb[34].mxu0 }
 0x4bc   : > { %v2153_v23 = vpop.f32.mrb[35].mxu0  ;;  %1839 = vst.msk [vmem:[%s292_s25] sm:$0xff] %vm1795_vm10, %v1834_v59 }
 0x4bd   : > { %2287 = shalt.err (!%p2284_p5)
}
 0x4be   : > { %s2288_s13 = scalar_lea.hbm %s2857_s8, 128  ;;  %s2292_s16 = scalar_lea.hbm %s2910_s5, 256 }
 0x4bf   : > { %p2289_p6 = scmp.ne.s32.totalorder %s2857_s8, %s2288_s13  ;;  %p2293_p10 = scmp.lt.u32.totalorder %s2857_s8, %s2910_s5 }
 0x4c0   : > { %p2294_p11 = scmp.lt.u32.totalorder %s2292_s16, %s2288_s13  ;;  %p2296_p13 = scmp.lt.u32.totalorder %s2288_s13, %s2857_s8 }
 0x4c1   : > { %p2290_p7 = pnand %p2289_p6, %p2438_p4 }
 0x4c2   : > { %p2295_p12 = por %p2294_p11, %p2293_p10 }
 0x4c3   : > { %p2291_p9 = pneg %p2290_p7 }
 0x4c4   : > { %p2297_p0 = por %p2296_p13, %p2295_p12 }
 0x4c6   : > { %p2298_p1 = pnand %p2297_p0, %p2291_p9 }
 0x4c8   : > { %2301 = shalt.err (!%p2298_p1)
}
 0x4c9   : > { %2154 = dma.vmem_to_hbm [thread:$0]  (%p2438_p4), %s2859_s27, 128, %s2857_s8, %s1841_s21  }
 0x4ca PF: > { %p2160_p2 = scmp.ge.s32.totalorder %s2352_s23, 2  ;;  %s1867_s25 = sand.u32 1, %s2332_s18  }
 0x4cb   : > { %s1868_s29 = scalar_lea.sflag [#allocation6], %s1867_s25 }
 0x4cc   : > { %p2157_p3 = pnand %p2160_p2, %p2445_p8 }
 0x4ce   : > { %2327 = dma.done.wait (!%p2157_p3), %s1868_s29, 128  }
 0x4cf   : > { %2329 = vsyncadd (!%p2157_p3), %s1868_s29, 4294967168  ;;  %s18_s23 = sadd.s32 1, %s2352_s23   ;;  %s2913_s18 = smov %s2336_s19 }
 0x4d0   : > { %p15_p5 = scmp.ge.s32.totalorder %s18_s23, 4   ;;  %s2914_s19 = smov %s2340_s20 }
 0x4d1   : > { %s2915_s20 = smov %s2451_s6  ;;  %s2916_s21 = smov %s2348_s22 }
 0x4d2   : > { %s2917_s22 = smov %s2919_s26  ;;  %17 = sbr.rel (!%p15_p5) target bundleno = 4 (0x4), region = 89 }
 0x4d9   :  { %1873 = vsyncpa [#allocation6], 1 }
 0x4da   :  { %1875 = vsyncpa [#allocation6 + $0x1], 1 }

</bundles_post_ra>
